<compile_context>
chip_gen: v7x
topology: tpu7x:2x2x1
jax: 0.10.0
libtpu: 0.0.40
codegen_flags: <defaults>
</compile_context>

<pallas_src>
import jax
import jax.numpy as jnp
from jax.experimental import pallas as pl
from jax.experimental.pallas import tpu as pltpu


def _pick_tile(n: int, target: int) -> int:
    """Largest multiple-of-8 tile <= target that divides n; falls back to n (full dim,
    which is always a legal block shape)."""
    if n <= target:
        return n
    for t in range(target, 7, -1):
        if t % 8 == 0 and n % t == 0:
            return t
    return n  # no clean divisor: use the full dimension (may cost VMEM for huge odd N)


def _vmem_limit_bytes() -> int:
    try:
        cap = int(pltpu.get_tpu_info().vmem_capacity_bytes)
    except Exception:
        cap = 64 * 1024 * 1024
    # ~3/4 of physical VMEM, capped at 96 MiB (v5e/v6e -> 96 MiB, v7x -> ~48 MiB).
    return int(min((cap * 3) // 4, 96 * 1024 * 1024))


def _make_qkv_kernel():
    def kernel(x_ref, wq_ref, wk_ref, wv_ref, q_ref, k_ref, v_ref):
        xb = x_ref[0]                                                       # (TR, C) bf16
        q_ref[0] = jnp.dot(xb, wq_ref[...],
                           preferred_element_type=jnp.float32).astype(q_ref.dtype)
        k_ref[0] = jnp.dot(xb, wk_ref[...],
                           preferred_element_type=jnp.float32).astype(k_ref.dtype)
        v_ref[0] = jnp.dot(xb, wv_ref[...],
                           preferred_element_type=jnp.float32).astype(v_ref.dtype)
    return kernel


def _make_attention_kernel(num_heads: int, head_dim: int, tq: int, tk: int):
    H, hd = num_heads, head_dim
    C = H * hd

    def kernel(q_ref, k_ref, v_ref, wp_ref, bp_ref, o_ref, m_sc, l_sc, acc_sc):
        # q_ref: (1, TQ, C) bf16 (scale already folded into Wq)
        # k_ref/v_ref: (1, TK, C) bf16 -- the current KV tile only
        # wp_ref: (C, out) bf16; bp_ref: (1, out) f32; o_ref: (1, TQ, out)
        kv = pl.program_id(2)

        @pl.when(kv == 0)
        def _init():
            m_sc[...] = jnp.full(m_sc.shape, -jnp.inf, dtype=m_sc.dtype)
            l_sc[...] = jnp.zeros(l_sc.shape, dtype=l_sc.dtype)
            acc_sc[...] = jnp.zeros(acc_sc.shape, dtype=acc_sc.dtype)

        qh = q_ref[0].reshape(tq, H, hd)
        kh = k_ref[0].reshape(tk, H, hd)
        vh = v_ref[0].reshape(tk, H, hd)

        # Batched-over-heads scores; softmax math stays f32 (safe on v5e; a bf16 exp on
        # v6e/v7x is a possible further EUP win but needs re-validation).
        s = jnp.einsum('qhd,khd->hqk', qh, kh,
                       preferred_element_type=jnp.float32)                  # (H, TQ, TK)
        m_prev = m_sc[...]
        m_new = jnp.maximum(m_prev, s.max(axis=-1, keepdims=True))
        alpha = jnp.exp(m_prev - m_new)
        p = jnp.exp(s - m_new)
        l_sc[...] = alpha * l_sc[...] + p.sum(axis=-1, keepdims=True)
        acc_sc[...] = alpha * acc_sc[...] + jnp.einsum(
            'hqk,khd->hqd', p.astype(jnp.bfloat16), vh,
            preferred_element_type=jnp.float32)
        m_sc[...] = m_new

        @pl.when(kv == pl.num_programs(2) - 1)
        def _finalize():
            # Normalize (EUP reciprocal), merge heads, fused output projection + bias.
            y = acc_sc[...] * pl.reciprocal(l_sc[...], approx=True)         # (H, TQ, hd)
            # TODO(synk): this (H,TQ,hd)->(TQ,H,hd) relayout runs once per query tile; a
            # head-major K/V layout would remove it at the cost of lane-sparse (hd) DMAs.
            y = jnp.transpose(y, (1, 0, 2)).reshape(tq, C).astype(jnp.bfloat16)
            out = jnp.dot(y, wp_ref[...], preferred_element_type=jnp.float32)
            out = out + bp_ref[...]
            o_ref[0] = out.astype(o_ref.dtype)

    return kernel


def attention_forward(x, wqkv, wproj, bproj, *, num_heads):
    """x: (B, N, C); wqkv: (3C, C); wproj: (out_dim, C); bproj: (out_dim,)."""
    B, N, C = x.shape
    out_dim = wproj.shape[0]
    head_dim = C // num_heads
    scale = head_dim ** (-0.5)

    # Tile targets capped at 256 so query/kv tiles plus f32 score/acc intermediates fit
    # v7x's 64 MiB VMEM as well as v5e/v6e.
    tq = _pick_tile(N, 256)
    tk = _pick_tile(N, 256)
    tr = _pick_tile(N, 256)
    n_q, n_kv, n_r = N // tq, N // tk, N // tr
    vmem_limit = _vmem_limit_bytes()

    # Host-side (free) prep: bf16 activations/weights for the MXU, pre-transposed for
    # y = x @ W^T, softmax scale folded into Wq.
    x_bf = x.astype(jnp.bfloat16)
    wq_t = (wqkv[0 * C:1 * C] * scale).T.astype(jnp.bfloat16)   # (C, C), scale folded
    wk_t = wqkv[1 * C:2 * C].T.astype(jnp.bfloat16)             # (C, C)
    wv_t = wqkv[2 * C:3 * C].T.astype(jnp.bfloat16)             # (C, C)
    wp_t = wproj.T.astype(jnp.bfloat16)                         # (C, out_dim)
    bp2d = bproj.reshape(1, out_dim).astype(jnp.float32)

    # ---- Stage 1: fused QKV projection, computed once per token (K/V hoist). ----
    q, k, v = pl.pallas_call(
        _make_qkv_kernel(),
        out_shape=(jax.ShapeDtypeStruct((B, N, C), jnp.bfloat16),
                   jax.ShapeDtypeStruct((B, N, C), jnp.bfloat16),
                   jax.ShapeDtypeStruct((B, N, C), jnp.bfloat16)),
        grid_spec=pltpu.PrefetchScalarGridSpec(
            num_scalar_prefetch=0,
            grid=(B, n_r),
            in_specs=[
                pl.BlockSpec((1, tr, C), lambda b, r: (b, r, 0)),
                # Grid-invariant weights (fetched once; still double-buffered by the
                # pipeline -- pl.Buffered(1) is an option if VMEM gets tight at huge C).
                pl.BlockSpec((C, C), lambda b, r: (0, 0)),
                pl.BlockSpec((C, C), lambda b, r: (0, 0)),
                pl.BlockSpec((C, C), lambda b, r: (0, 0)),
            ],
            out_specs=[
                pl.BlockSpec((1, tr, C), lambda b, r: (b, r, 0)),
                pl.BlockSpec((1, tr, C), lambda b, r: (b, r, 0)),
                pl.BlockSpec((1, tr, C), lambda b, r: (b, r, 0)),
            ],
        ),
        compiler_params=pltpu.CompilerParams(
            dimension_semantics=("parallel", "parallel"),
            vmem_limit_bytes=vmem_limit),
    )(x_bf, wq_t, wk_t, wv_t)

    # ---- Stage 2: flash attention (kv tiles as a grid axis) + fused output proj. ----
    kernel = _make_attention_kernel(num_heads, head_dim, tq, tk)
    out = pl.pallas_call(
        kernel,
        out_shape=jax.ShapeDtypeStruct((B, N, out_dim), x.dtype),
        grid_spec=pltpu.PrefetchScalarGridSpec(
            num_scalar_prefetch=0,
            grid=(B, n_q, n_kv),
            in_specs=[
                pl.BlockSpec((1, tq, C), lambda b, qi, kv: (b, qi, 0)),   # Q tile (kv-invariant)
                pl.BlockSpec((1, tk, C), lambda b, qi, kv: (b, kv, 0)),   # K tile (streamed)
                pl.BlockSpec((1, tk, C), lambda b, qi, kv: (b, kv, 0)),   # V tile (streamed)
                pl.BlockSpec((C, out_dim), lambda b, qi, kv: (0, 0)),     # Wproj^T (invariant)
                pl.BlockSpec((1, out_dim), lambda b, qi, kv: (0, 0)),     # proj bias
            ],
            out_specs=pl.BlockSpec((1, tq, out_dim), lambda b, qi, kv: (b, qi, 0)),
            scratch_shapes=[
                pltpu.VMEM((num_heads, tq, 1), jnp.float32),              # running max m
                pltpu.VMEM((num_heads, tq, 1), jnp.float32),              # running denom l
                pltpu.VMEM((num_heads, tq, head_dim), jnp.float32),       # running acc
            ],
        ),
        compiler_params=pltpu.CompilerParams(
            dimension_semantics=("parallel", "parallel", "arbitrary"),
            vmem_limit_bytes=vmem_limit),
    )(q, k, v, wp_t, bp2d)
    return out


def reference_forward(x, wqkv, wproj, bproj, *, num_heads):
    B, N, C = x.shape
    head_dim = C // num_heads
    scale = head_dim ** (-0.5)
    qkv = jnp.einsum("bnc,dc->bnd", x, wqkv)                      # (B, N, 3C)
    qkv = qkv.reshape(B, N, 3, num_heads, head_dim).transpose(2, 0, 3, 1, 4)
    q, k, v = qkv[0], qkv[1], qkv[2]                               # (B, H, N, hd)
    attn = jnp.einsum("bhnd,bhmd->bhnm", q, k) * scale
    attn = jax.nn.softmax(attn, axis=-1)
    y = jnp.einsum("bhnm,bhmd->bhnd", attn, v)                     # (B, H, N, hd)
    y = y.transpose(0, 2, 1, 3).reshape(B, N, C)
    return jnp.einsum("bnc,oc->bno", y, wproj) + bproj


if __name__ == "__main__":
    key = jax.random.PRNGKey(0)
    B, N, C = 2, 8, 32
    num_heads = 8
    out_dim = C  # out_dim = out_dim or dim

    k_x, k_wqkv, k_wproj, k_bproj = jax.random.split(key, 4)
    x = jax.random.normal(k_x, (B, N, C), dtype=jnp.float32)
    # Deterministic synthetic params (shapes follow nn.Linear: (out, in))
    wqkv = jax.random.normal(k_wqkv, (3 * C, C), dtype=jnp.float32) * 0.05
    wproj = jax.random.normal(k_wproj, (out_dim, C), dtype=jnp.float32) * 0.05
    bproj = jax.random.normal(k_bproj, (out_dim,), dtype=jnp.float32) * 0.01

    out = attention_forward(x, wqkv, wproj, bproj, num_heads=num_heads)
    out = jax.block_until_ready(out)

    ref = reference_forward(x, wqkv, wproj, bproj, num_heads=num_heads)
    assert out.shape == (B, N, out_dim)
    # bf16 MXU operands (f32 accumulation) -> slightly loose tolerance vs f32 reference.
    max_err = float(jnp.max(jnp.abs(out - ref)))
    assert jnp.allclose(out, ref, atol=2e-2, rtol=2e-2), f"mismatch vs reference: {max_err}"

    # TODO(synk): mask_type / static_a / dropout branches are omitted (module defaults:
    # mask_type=None, static=False, eval-mode dropout is identity).
    print("KERNEL_OK")
</pallas_src>

<mosaic_0001>
module attributes {stable_mosaic.version = 11 : i64} {
  func.func @kernel(%arg0: i32, %arg1: i32, %arg2: memref<1x8x32xbf16, #tpu.memory_space<vmem>>, %arg3: memref<32x32xbf16, #tpu.memory_space<vmem>>, %arg4: memref<32x32xbf16, #tpu.memory_space<vmem>>, %arg5: memref<32x32xbf16, #tpu.memory_space<vmem>>, %arg6: memref<1x8x32xbf16, #tpu.memory_space<vmem>>, %arg7: memref<1x8x32xbf16, #tpu.memory_space<vmem>>, %arg8: memref<1x8x32xbf16, #tpu.memory_space<vmem>>) attributes {dimension_semantics = [#tpu.dimension_semantics<parallel>, #tpu.dimension_semantics<parallel>], iteration_bounds = array<i64: 2, 1>, scalar_prefetch = 0 : i64, scratch_operands = 0 : i64, tpu.core_type = #tpu.core_type<tc>, window_params = [{transform_indices = @transform_0, window_bounds = array<i64: 1, 8, 32>}, {pipeline_mode = #tpu.pipeline_mode<synchronous>, transform_indices = @transform_1, window_bounds = array<i64: 32, 32>}, {pipeline_mode = #tpu.pipeline_mode<synchronous>, transform_indices = @transform_2, window_bounds = array<i64: 32, 32>}, {pipeline_mode = #tpu.pipeline_mode<synchronous>, transform_indices = @transform_3, window_bounds = array<i64: 32, 32>}, {transform_indices = @transform_4, window_bounds = array<i64: 1, 8, 32>}, {transform_indices = @transform_5, window_bounds = array<i64: 1, 8, 32>}, {transform_indices = @transform_6, window_bounds = array<i64: 1, 8, 32>}]} {
    %c0 = arith.constant 0 : index
    %c0_0 = arith.constant 0 : index
    %c0_1 = arith.constant 0 : index
    %0 = vector.load %arg2[%c0, %c0_0, %c0_1] : memref<1x8x32xbf16, #tpu.memory_space<vmem>>, vector<1x8x32xbf16>
    %1 = vector.shape_cast %0 : vector<1x8x32xbf16> to vector<8x32xbf16>
    %c0_2 = arith.constant 0 : index
    %c0_3 = arith.constant 0 : index
    %2 = vector.load %arg3[%c0_2, %c0_3] : memref<32x32xbf16, #tpu.memory_space<vmem>>, vector<32x32xbf16>
    %cst = arith.constant dense<0.000000e+00> : vector<8x32xf32>
    %3 = tpu.matmul %1, %2, %cst {dimension_numbers = #tpu.dot_dimension_numbers<[1], [0], [0], [1], [0, 0, 1, 1], [], []>} : vector<8x32xbf16>, vector<32x32xbf16>, vector<8x32xf32> -> vector<8x32xf32>
    %4 = arith.truncf %3 : vector<8x32xf32> to vector<8x32xbf16>
    %c0_4 = arith.constant 0 : index
    %c0_5 = arith.constant 0 : index
    %c0_6 = arith.constant 0 : index
    %5 = vector.load %arg6[%c0_4, %c0_5, %c0_6] : memref<1x8x32xbf16, #tpu.memory_space<vmem>>, vector<1x8x32xbf16>
    %6 = vector.shape_cast %5 : vector<1x8x32xbf16> to vector<8x32xbf16>
    %7 = vector.shape_cast %4 : vector<8x32xbf16> to vector<1x8x32xbf16>
    tpu.vector_store %arg6[%c0_4, %c0_5, %c0_6], %7 {strides = array<i32>} : memref<1x8x32xbf16, #tpu.memory_space<vmem>>, vector<1x8x32xbf16>,
    %c0_7 = arith.constant 0 : index
    %c0_8 = arith.constant 0 : index
    %8 = vector.load %arg4[%c0_7, %c0_8] : memref<32x32xbf16, #tpu.memory_space<vmem>>, vector<32x32xbf16>
    %cst_9 = arith.constant dense<0.000000e+00> : vector<8x32xf32>
    %9 = tpu.matmul %1, %8, %cst_9 {dimension_numbers = #tpu.dot_dimension_numbers<[1], [0], [0], [1], [0, 0, 1, 1], [], []>} : vector<8x32xbf16>, vector<32x32xbf16>, vector<8x32xf32> -> vector<8x32xf32>
    %10 = arith.truncf %9 : vector<8x32xf32> to vector<8x32xbf16>
    %c0_10 = arith.constant 0 : index
    %c0_11 = arith.constant 0 : index
    %c0_12 = arith.constant 0 : index
    %11 = vector.load %arg7[%c0_10, %c0_11, %c0_12] : memref<1x8x32xbf16, #tpu.memory_space<vmem>>, vector<1x8x32xbf16>
    %12 = vector.shape_cast %11 : vector<1x8x32xbf16> to vector<8x32xbf16>
    %13 = vector.shape_cast %10 : vector<8x32xbf16> to vector<1x8x32xbf16>
    tpu.vector_store %arg7[%c0_10, %c0_11, %c0_12], %13 {strides = array<i32>} : memref<1x8x32xbf16, #tpu.memory_space<vmem>>, vector<1x8x32xbf16>,
    %c0_13 = arith.constant 0 : index
    %c0_14 = arith.constant 0 : index
    %14 = vector.load %arg5[%c0_13, %c0_14] : memref<32x32xbf16, #tpu.memory_space<vmem>>, vector<32x32xbf16>
    %cst_15 = arith.constant dense<0.000000e+00> : vector<8x32xf32>
    %15 = tpu.matmul %1, %14, %cst_15 {dimension_numbers = #tpu.dot_dimension_numbers<[1], [0], [0], [1], [0, 0, 1, 1], [], []>} : vector<8x32xbf16>, vector<32x32xbf16>, vector<8x32xf32> -> vector<8x32xf32>
    %16 = arith.truncf %15 : vector<8x32xf32> to vector<8x32xbf16>
    %c0_16 = arith.constant 0 : index
    %c0_17 = arith.constant 0 : index
    %c0_18 = arith.constant 0 : index
    %17 = vector.load %arg8[%c0_16, %c0_17, %c0_18] : memref<1x8x32xbf16, #tpu.memory_space<vmem>>, vector<1x8x32xbf16>
    %18 = vector.shape_cast %17 : vector<1x8x32xbf16> to vector<8x32xbf16>
    %19 = vector.shape_cast %16 : vector<8x32xbf16> to vector<1x8x32xbf16>
    tpu.vector_store %arg8[%c0_16, %c0_17, %c0_18], %19 {strides = array<i32>} : memref<1x8x32xbf16, #tpu.memory_space<vmem>>, vector<1x8x32xbf16>,
    return
  }
  func.func @transform_0(%arg0: i32, %arg1: i32) -> (i32, i32, i32) {
    %c0_i32 = arith.constant 0 : i32
    %c0_i32_0 = arith.constant 0 : i32
    return %arg0, %arg1, %c0_i32 : i32, i32, i32
  }
  func.func @transform_1(%arg0: i32, %arg1: i32) -> (i32, i32) {
    %c0_i32 = arith.constant 0 : i32
    %c0_i32_0 = arith.constant 0 : i32
    %c0_i32_1 = arith.constant 0 : i32
    return %c0_i32, %c0_i32_0 : i32, i32
  }
  func.func @transform_2(%arg0: i32, %arg1: i32) -> (i32, i32) {
    %c0_i32 = arith.constant 0 : i32
    %c0_i32_0 = arith.constant 0 : i32
    %c0_i32_1 = arith.constant 0 : i32
    return %c0_i32, %c0_i32_0 : i32, i32
  }
  func.func @transform_3(%arg0: i32, %arg1: i32) -> (i32, i32) {
    %c0_i32 = arith.constant 0 : i32
    %c0_i32_0 = arith.constant 0 : i32
    %c0_i32_1 = arith.constant 0 : i32
    return %c0_i32, %c0_i32_0 : i32, i32
  }
  func.func @transform_4(%arg0: i32, %arg1: i32) -> (i32, i32, i32) {
    %c0_i32 = arith.constant 0 : i32
    %c0_i32_0 = arith.constant 0 : i32
    return %arg0, %arg1, %c0_i32 : i32, i32, i32
  }
  func.func @transform_5(%arg0: i32, %arg1: i32) -> (i32, i32, i32) {
    %c0_i32 = arith.constant 0 : i32
    %c0_i32_0 = arith.constant 0 : i32
    return %arg0, %arg1, %c0_i32 : i32, i32, i32
  }
  func.func @transform_6(%arg0: i32, %arg1: i32) -> (i32, i32, i32) {
    %c0_i32 = arith.constant 0 : i32
    %c0_i32_0 = arith.constant 0 : i32
    return %arg0, %arg1, %c0_i32 : i32, i32, i32
  }
}

</mosaic_0001>

<bundles_post_ra>
// kernel: tpu_custom_call.1
= control target key start
LH: loop header
LB: loop body
LE: loop exit
PB: predicated region body
PF: predicated region fallthrough
CT: control target
= control target key end

     0   :  { %12 = vsyncpa [#allocation3], 0  ;;  %s1623_s0 = inlined_call_operand.hbm [shape: bf16[2,8,32], index: 0, kind: input, shape index: {}]   ;;  %s1624_s1 = inlined_call_operand.hbm [shape: bf16[32,32], index: 1, kind: input, shape index: {}]   ;;  %s1625_s2 = inlined_call_operand.hbm [shape: bf16[32,32], index: 2, kind: input, shape index: {}]   ;;  %s1626_s3 = inlined_call_operand.hbm [shape: bf16[32,32], index: 3, kind: input, shape index: {}]   ;;  %s1627_s4 = inlined_call_operand.hbm [shape: bf16[2,8,32], index: 4, kind: output, shape index: {0}]   ;;  %s1628_s5 = inlined_call_operand.hbm [shape: bf16[2,8,32], index: 5, kind: output, shape index: {1}]   ;;  %s1629_s6 = inlined_call_operand.hbm [shape: bf16[2,8,32], index: 6, kind: output, shape index: {2}]  }
   0x1   :  { %14 = vsyncpa [#allocation3 + $0x1], 0 }
   0x2   :  { %15 = vsyncpa [#allocation6], 0 }
   0x3   :  { %16 = vsyncpa [#allocation9], 0 }
   0x4   :  { %17 = vsyncpa [#allocation4], 0 }
   0x5   :  { %19 = vsyncpa [#allocation4 + $0x1], 0 }
   0x6   :  { %20 = vsyncpa [#allocation12], 0 }
   0x7   :  { %22 = vsyncpa [#allocation12 + $0x1], 0  ;;  %s1248_s21 = smov 0   ;;  %s1250_s22 = smov 0  }
   0x8   :  { %s1252_s23 = smov 0   ;;  %s1254_s24 = smov 0  }
   0x9   :  { %s1256_s25 = smov 0   ;;  %s1258_s26 = smov 0  }
   0xa LB: > { %1636 = sst [smem:[#allocation19_spill]] %s1180_s21  ;;  %s1279_s27 = sadd.s32 4294967295, %s1200_s26   ;;  %s1200_s26 = sphi %s1258_s26, %s28_s26   ;;  %s1196_s25 = sphi %s1256_s25, %s1662_s25   ;;  %s1192_s24 = sphi %s1254_s24, %s1661_s24   ;;  %s1188_s23 = sphi %s1252_s23, %s1660_s23   ;;  %s1184_s22 = sphi %s1250_s22, %s1659_s22   ;;  %s1180_s21 = sphi %s1248_s21, %s1658_s21  }
   0xb   : > { %s1631_s28 = sadd.s32 4294967294, %s1200_s26   ;;  %p62_p0 = scmp.ne.s32.totalorder %s1184_s22, %s1180_s21 }
   0xc   : > { %p1630_p1 = scmp.eq.s32.totalorder %s1279_s27, 0  ;;  %p157_p3 = scmp.eq.s32.totalorder %s1631_s28, 1 }
   0xd   : > { %p758_p5 = scmp.ge.s32.totalorder %s1200_s26, 1  ;;  %p220_p7 = scmp.lt.s32.totalorder %s1200_s26, 3 }
   0xe   : > { %p1290_p4 = por %p1630_p1, %p62_p0  ;;  %p1295_p6 = por %p157_p3, %p62_p0 }
   0xf   : > { %p1300_p8 = pnand %p758_p5, %p220_p7  ;;  %s1202_s8 = smov [#allocation5]  }
  0x10   : > { %s1637_s29 = scalar_select %p1290_p4, 1, 0 }
  0x11   : > { %s1638_s30 = scalar_select %p1295_p6, 1, 0 }
  0x12   : > { %s1640_s7 = scalar_select %p1300_p8, 1, 0 }
  0x13   : > { %1639 = sst [smem:[#allocation20_spill]] %s1638_s30  ;;  %s232_s9 = sshll.u32 %s1202_s8, 4  ;;  %s1304_s9 = int_to_ptr.vmem [resolvable:$true] %s232_s9 }
  0x14   : > { %p843_p9 = pneg %p1300_p8  ;;  %s1203_s11 = smov [#allocation7]  }
  0x15   : > { %s245_s12 = sshll.u32 %s1203_s11, 4  ;;  %s1204_s13 = smov [#allocation8]   ;;  %s1315_s12 = int_to_ptr.vmem [resolvable:$true] %s245_s12 }
  0x16   : > { %p1311_p11 = pnand %p843_p9, %p1630_p1  ;;  %s1317_s14 = sshll.u32 %s1204_s13, 4  ;;  %s259_s14 = int_to_ptr.vmem [resolvable:$true] %s1317_s14 }
  0x17   : > { %s936_s17 = scalar_lea.hbm %s1624_s1, 256 }
  0x18   : > { %p937_p12 = scmp.ne.s32.totalorder %s1624_s1, %s936_s17  ;;  %p1327_p13 = pneg %p1311_p11 }
  0x19   : > { %p943_p5 = scmp.lt.u32.totalorder %s936_s17, %s1624_s1 }
  0x1a   : > { %p939_p0 = pnand %p1327_p13, %p937_p12 }
  0x1c   : > { %p940_p3 = pneg %p939_p0 }
  0x1e   : > { %p945_p7 = pnand %p943_p5, %p940_p3 }
  0x20   : > { %948 = shalt.err (!%p945_p7)
}
  0x21   : > { %s949_s13 = scalar_lea.vmem %s1304_s9, 256  ;;  %p957_p2 = scmp.lt.s32.totalorder %s1304_s9, %s1304_s9 }
  0x22   : > { %p950_p9 = scmp.ne.s32.totalorder %s1304_s9, %s949_s13  ;;  %p958_p6 = scmp.lt.s32.totalorder %s949_s13, %s949_s13 }
  0x24   : > { %p952_p10 = pnand %p950_p9, %p1327_p13  ;;  %p959_p12 = por %p958_p6, %p957_p2 }
  0x26   : > { %p953_p1 = pneg %p952_p10 }
  0x28   : > { %p960_p0 = pnand %p959_p12, %p953_p1 }
  0x2a   : > { %963 = shalt.err (!%p960_p0)
}
  0x2b   : > { %s1205_s15 = smov 64   ;;  %s1206_s16 = smov 4  }
  0x2c   : > { %846 = dma.hbm_to_vmem [thread:$0]  (!%p1311_p11), %s1624_s1, 256, %s1304_s9, [#allocation6], %s1205_s15, %s1205_s15, %s1206_s16  }
  0x2d   : > { %s964_s11 = scalar_lea.hbm %s1625_s2, 256 }
  0x2e   : > { %p965_p1 = scmp.ne.s32.totalorder %s1625_s2, %s964_s11  ;;  %p971_p10 = scmp.lt.u32.totalorder %s964_s11, %s1625_s2 }
  0x30   : > { %p967_p2 = pnand %p965_p1, %p1327_p13 }
  0x32   : > { %p968_p6 = pneg %p967_p2 }
  0x34   : > { %p973_p3 = pnand %p971_p10, %p968_p6 }
  0x36   : > { %976 = shalt.err (!%p973_p3)
}
  0x37   : > { %s977_s9 = scalar_lea.vmem %s1315_s12, 256  ;;  %p985_p12 = scmp.lt.s32.totalorder %s1315_s12, %s1315_s12 }
  0x38   : > { %p978_p5 = scmp.ne.s32.totalorder %s1315_s12, %s977_s9  ;;  %p986_p0 = scmp.lt.s32.totalorder %s977_s9, %s977_s9 }
  0x3a   : > { %p980_p7 = pnand %p978_p5, %p1327_p13  ;;  %p987_p1 = por %p986_p0, %p985_p12 }
  0x3c   : > { %p981_p9 = pneg %p980_p7 }
  0x3e   : > { %p988_p2 = pnand %p987_p1, %p981_p9 }
  0x40   : > { %991 = shalt.err (!%p988_p2)
}
  0x41   : > { %849 = dma.hbm_to_vmem [thread:$0]  (!%p1311_p11), %s1625_s2, 256, %s1315_s12, [#allocation6], %s1205_s15, %s1205_s15, %s1206_s16  }
  0x42   : > { %s992_s18 = scalar_lea.hbm %s1626_s3, 256 }
  0x43   : > { %p993_p6 = scmp.ne.s32.totalorder %s1626_s3, %s992_s18  ;;  %p999_p5 = scmp.lt.u32.totalorder %s992_s18, %s1626_s3 }
  0x45   : > { %p995_p10 = pnand %p993_p6, %p1327_p13 }
  0x47   : > { %p996_p3 = pneg %p995_p10 }
  0x49   : > { %p1001_p7 = pnand %p999_p5, %p996_p3 }
  0x4b   : > { %1004 = shalt.err (!%p1001_p7)
}
  0x4c   : > { %s1005_s9 = scalar_lea.vmem %s259_s14, 256  ;;  %p1013_p1 = scmp.lt.s32.totalorder %s259_s14, %s259_s14 }
  0x4d   : > { %p1006_p9 = scmp.ne.s32.totalorder %s259_s14, %s1005_s9  ;;  %p1014_p2 = scmp.lt.s32.totalorder %s1005_s9, %s1005_s9 }
  0x4f   : > { %p1008_p12 = pnand %p1006_p9, %p1327_p13  ;;  %p1015_p4 = por %p1014_p2, %p1013_p1 }
  0x51   : > { %p1009_p0 = pneg %p1008_p12 }
  0x53   : > { %p1016_p8 = pnand %p1015_p4, %p1009_p0 }
  0x55   : > { %1019 = shalt.err (!%p1016_p8)
}
  0x56   : > { %852 = dma.hbm_to_vmem [thread:$0]  (!%p1311_p11), %s1626_s3, 256, %s259_s14, [#allocation9], %s1205_s15, %s1205_s15, %s1206_s16  }
  0x57   : > { %s49_s20 = sadd.s32 1, %s1188_s23  ;;  %s40_s10 = sadd.s32 1, %s1196_s25 }
  0x58   : > { %p56_p4 = scmp.ne.s32.totalorder %s1188_s23, %s1184_s22  ;;  %p42_p8 = scmp.ge.s32.totalorder %s40_s10, 2 }
  0x59   : > { %p57_p13 = scmp.eq.s32.totalorder %s1200_s26, 0  ;;  %p1643_p6 = scmp.eq.s32.totalorder %s1279_s27, 1 }
  0x5a   : > { %p870_p3 = scmp.lt.s32.totalorder %s1200_s26, 2  ;;  %s1664_s10 = smov (%p42_p8, %s40_s10), 0 }
  0x5b   : > { %p1406_p10 = por %p1643_p6, %p56_p4  ;;  %p58_p5 = por %p57_p13, %p56_p4 }
  0x5c   : > { %s272_s30 = sand.u32 1, %s1188_s23   ;;  %s44_s17 = ssub.s32 %s1196_s25, %s1664_s10 }
  0x5d   : > { %p47_p7 = scmp.eq.s32.totalorder %s44_s17, 0  ;;  %s763_s14 = sshll.u32 %s272_s30, 2 }
  0x5e   : > { %s764_s15 = sshll.u32 %s1196_s25, 6  ;;  %s276_s11 = scalar_lea.vmem [#allocation2], %s763_s14 }
  0x5f   : > { %s1418_s16 = scalar_select %p47_p7, %s1188_s23, %s49_s20  }
  0x60   : > { %s1423_s8 = scalar_lea.hbm %s1623_s0, %s764_s15  ;;  %s284_s13 = sshll.u32 %s276_s11, 4  ;;  %s1425_s13 = int_to_ptr.vmem [resolvable:$true] %s284_s13 }
  0x61   : > { %p1429_p11 = pnand %p870_p3, %p58_p5  ;;  %s273_s12 = scalar_lea.sflag [#allocation3], %s272_s30 }
  0x62   : > { %s1020_s21 = scalar_lea.hbm %s1423_s8, 64  ;;  %s1025_s14 = scalar_lea.hbm %s1623_s0, 128 }
  0x63   : > { %p1021_p9 = scmp.ne.s32.totalorder %s1423_s8, %s1020_s21  ;;  %p1022_p12 = pneg %p1429_p11 }
  0x64   : > { %p1026_p2 = scmp.lt.u32.totalorder %s1423_s8, %s1623_s0  ;;  %p1027_p4 = scmp.lt.u32.totalorder %s1025_s14, %s1020_s21 }
  0x65   : > { %p1023_p0 = pnand %p1022_p12, %p1021_p9  ;;  %p1029_p13 = scmp.lt.u32.totalorder %s1020_s21, %s1423_s8 }
  0x66   : > { %p1028_p8 = por %p1027_p4, %p1026_p2 }
  0x67   : > { %p1024_p1 = pneg %p1023_p0 }
  0x68   : > { %p1030_p6 = por %p1029_p13, %p1028_p8 }
  0x6a   : > { %p1031_p3 = pnand %p1030_p6, %p1024_p1 }
  0x6c   : > { %1034 = shalt.err (!%p1031_p3)
}
  0x6d   : > { %s1035_s30 = scalar_lea.vmem %s1425_s13, 64  ;;  %s1207_s19 = smov [#allocation2]  }
  0x6e   : > { %p1036_p5 = scmp.ne.s32.totalorder %s1425_s13, %s1035_s30  ;;  %s1040_s11 = sshll.u32 %s1207_s19, 4  ;;  %s1041_s11 = int_to_ptr.vmem [resolvable:$false] %s1040_s11 }
  0x6f   : > { %s1042_s20 = scalar_lea.vmem %s1041_s11, 128  ;;  %p1043_p0 = scmp.lt.s32.totalorder %s1425_s13, %s1041_s11 }
  0x70   : > { %p1038_p7 = pnand %p1036_p5, %p1022_p12  ;;  %p1044_p2 = scmp.lt.s32.totalorder %s1042_s20, %s1035_s30 }
  0x72   : > { %p1039_p9 = pneg %p1038_p7  ;;  %p1045_p4 = por %p1044_p2, %p1043_p0 }
  0x74   : > { %p1046_p8 = pnand %p1045_p4, %p1039_p9 }
  0x76   : > { %1049 = shalt.err (!%p1046_p8)
}
  0x77   : > { %856 = dma.hbm_to_vmem [thread:$0]  (!%p1429_p11), %s1423_s8, 64, %s1425_s13, %s273_s12  }
  0x78   : > { %p1646_p1 = scmp.ne.s32.totalorder %s1640_s7, 0 }
  0x79   : > { %s1461_s21 = sand.u32 (!%p1646_p1), 1, %s1184_s22   ;;  %p1647_p12 = scmp.ne.s32.totalorder (!%p1646_p1), %s1637_s29, 0 }
  0x7a   : > { %293 = sbr.rel (%p1646_p1) target bundleno = 421 (0x1a5), region = 36  ;;  %s1464_s17 = sshll.u32 (!%p1646_p1), %s1461_s21, 2 }
  0x7b   : > { %s296_s14 = scalar_lea.sflag (!%p1646_p1), [#allocation3], %s1461_s21  ;;  %s299_s15 = scalar_lea.vmem (!%p1646_p1), [#allocation2], %s1464_s17 }
  0x81   : > { %1159 = dma.done.wait (%p1647_p12), %s296_s14, 64  }
  0x82   : > { %1161 = vsyncadd (%p1647_p12), %s296_s14, 4294967232  ;;  %p1648_p11 = scmp.eq.s32.totalorder %s1279_s27, 0 }
  0x84   : > { %1163 = dma.done.wait (%p1648_p11), [#allocation6], 512   ;;  %p1649_p13 = pmov %p1648_p11 }
  0x85   : > { %p1650_p6 = pmov %p1648_p11 }
  0x86   : > { %1165 = vsyncadd (%p1649_p13), [#allocation6], 4294966784 }
  0x87   : > { %1167 = dma.done.wait (%p1650_p6), [#allocation9], 256   ;;  %p1651_p3 = pmov %p1650_p6 }
  0x88   : > { %v1208_v0 = vmov 0.0   ;;  %vm1209_vm0 = vmmov 0   ;;  %v930_v1 = vld [vmem:[#allocation5] sm:$0xff]   ;;  %v931_v2 = vld [vmem:[#allocation5 + $0x8] sm:$0xff]   ;;  %v932_v3 = vld [vmem:[#allocation7] sm:$0xff]   ;;  %vm368_vm1 = vcmask 261120  }
  0x89   : > { %1169 = vsyncadd (%p1651_p3), [#allocation9], 4294967040  ;;  %799 = vmatprep.subr.bf16.mxu0 %v1208_v0  ;;  %807 = vmatprep.subr.bf16.mxu1 %v1208_v0  ;;  %v934_v4 = vld [vmem:[#allocation7 + $0x8] sm:$0xff]   ;;  %v933_v6 = vld [vmem:[#allocation8] sm:$0xff]   ;;  %s1484_s29 = sshll.u32 %s1192_s24, 6  ;;  %s335_s7 = scalar_lea.vmem [#allocation10], %s1464_s17 }
  0x8a   : > { %803 = vmatprep.mubr.msk.bf16.mxu0 %vm1209_vm0, %v1208_v0  ;;  %811 = vmatprep.mubr.msk.bf16.mxu1 %vm1209_vm0, %v1208_v0  ;;  %v351_v5 = vld [vmem:[%s299_s15] sm:$0xf]  ;;  %v935_v7 = vld [vmem:[#allocation8 + $0x8] sm:$0xff]   ;;  %s556_s8 = sshll.u32 %s335_s7, 4  ;;  %vm413_vm2 = vcmask 257024   ;;  %s342_s9 = scalar_lea.vmem [#allocation11], %s1464_s17  ;;  %s1497_s8 = int_to_ptr.vmem [resolvable:$true] %s556_s8 }
  0x8b   : > { %800 = vmatpush3.bf16.msra.mxu0 %v930_v1  ;;  %808 = vmatpush3.bf16.msra.mxu1 %v932_v3  ;;  %s570_s12 = sshll.u32 %s342_s9, 4  ;;  %s1495_s19 = scalar_lea.hbm %s1627_s4, %s1484_s29  ;;  %s1505_s12 = int_to_ptr.vmem [resolvable:$true] %s570_s12 }
  0x8c   : > { %801 = vmatprep.subr.bf16.mxu0 %v1208_v0  ;;  %809 = vmatprep.subr.bf16.mxu1 %v1208_v0  ;;  %s1503_s20 = scalar_lea.hbm %s1628_s5, %s1484_s29  ;;  %s532_s14 = scalar_lea.sflag [#allocation4], %s1461_s21 }
  0x8d   : > { %s1050_s15 = scalar_lea.vmem %s1497_s8, 64  ;;  %s1210_s18 = smov [#allocation10]  }
  0x8e   : > { %p1051_p5 = scmp.ne.s32.totalorder %s1497_s8, %s1050_s15  ;;  %s1054_s30 = sshll.u32 %s1210_s18, 4  ;;  %s1055_s30 = int_to_ptr.vmem [resolvable:$false] %s1054_s30 }
  0x8f   : > { %802 = vmatpush3.bf16.msra.mxu0 %v931_v2  ;;  %810 = vmatpush3.bf16.msra.mxu1 %v934_v4  ;;  %s1056_s13 = scalar_lea.vmem %s1055_s30, 128  ;;  %p1057_p0 = scmp.lt.s32.totalorder %s1497_s8, %s1055_s30 }
  0x90   : > { %815 = vmatprep.subr.bf16.mxu0 %v1208_v0  ;;  %p1052_p7 = pnand %p1051_p5, %p1406_p10  ;;  %p1058_p2 = scmp.lt.s32.totalorder %s1056_s13, %s1050_s15 }
  0x92   : > { %804 = vmatmul.mubr.msk.bf16.vlgmr.msra.gmra.mrb[0].mxu0 %vm368_vm1, %v351_v5  ;;  %812 = vmatmul.mubr.msk.bf16.vlgmr.msra.gmra.mrb[0].mxu1 %vm368_vm1, %v351_v5  ;;  %p1053_p9 = pneg %p1052_p7  ;;  %p1059_p4 = por %p1058_p2, %p1057_p0 }
  0x93   : > { %816 = vmatpush3.bf16.msra.mxu0 %v933_v6  ;;  %819 = vmatprep.mubr.msk.bf16.mxu0 %vm1209_vm0, %v1208_v0 }
  0x94   : > { %817 = vmatprep.subr.bf16.mxu0 %v1208_v0  ;;  %p1060_p8 = pnand %p1059_p4, %p1053_p9 }
  0x97   : > { %818 = vmatpush3.bf16.msra.mxu0 %v935_v7 }
  0x9a   : > { %820 = vmatmul.mubr.msk.bf16.vlgmr.msra.gmra.mrb[4].mxu0 %vm368_vm1, %v351_v5 }
 0x165   : > { %v406_v8 = vpop.f32.mrb[0].mxu0  ;;  %v465_v12 = vpop.f32.mrb[0].mxu1 }
 0x166   : > { %v412_v9 = vpack.c.bf16 %v406_v8, %v406_v8  ;;  %v805_v10 = vpop.f32.mrb[1].mxu0  ;;  %v471_v14 = vpack.c.bf16 %v465_v12, %v465_v12  ;;  %v813_v15 = vpop.f32.mrb[1].mxu1 }
 0x167   : > { %v409_v11 = vpop.f32.mrb[2].mxu0  ;;  %v468_v16 = vpop.f32.mrb[2].mxu1 }
 0x168   : > { %v806_v13 = vpop.f32.mrb[3].mxu0  ;;  %414 = vst.msk [vmem:[%s335_s7] sm:$0xf] %vm413_vm2, %v412_v9 }
 0x169   : > { %1063 = shalt.err (!%p1060_p8)
}
 0x16a   : > { %s1064_s21 = scalar_lea.hbm %s1495_s19, 64  ;;  %s1068_s11 = scalar_lea.hbm %s1627_s4, 128 }
 0x16b   : > { %p1065_p1 = scmp.ne.s32.totalorder %s1495_s19, %s1064_s21  ;;  %p1069_p13 = scmp.lt.u32.totalorder %s1495_s19, %s1627_s4 }
 0x16c   : > { %p1070_p6 = scmp.lt.u32.totalorder %s1068_s11, %s1064_s21  ;;  %p1072_p5 = scmp.lt.u32.totalorder %s1064_s21, %s1495_s19 }
 0x16d   : > { %p1066_p12 = pnand %p1065_p1, %p1406_p10 }
 0x16e   : > { %p1071_p3 = por %p1070_p6, %p1069_p13 }
 0x16f   : > { %p1067_p11 = pneg %p1066_p12 }
 0x170   : > { %p1073_p7 = por %p1072_p5, %p1071_p3 }
 0x172   : > { %p1074_p9 = pnand %p1073_p7, %p1067_p11 }
 0x174   : > { %1077 = shalt.err (!%p1074_p9)
}
 0x175   : > { %837 = dma.vmem_to_hbm [thread:$0]  (%p1406_p10), %s1497_s8, 64, %s1495_s19, %s532_s14   ;;  %v814_v17 = vpop.f32.mrb[3].mxu1  ;;  %472 = vst.msk [vmem:[%s342_s9] sm:$0xf] %vm413_vm2, %v471_v14 }
 0x176   : > { %s349_s13 = scalar_lea.vmem [#allocation13], %s1464_s17  ;;  %s1652_s21 = sand.u32 1, %s1279_s27  }
 0x177   : > { %s1536_s15 = sshll.u32 %s349_s13, 4  ;;  %s1540_s7 = scalar_lea.sflag [#allocation12], %s1652_s21  ;;  %s1571_s15 = int_to_ptr.vmem [resolvable:$true] %s1536_s15 }
 0x178   : > { %s1078_s24 = scalar_lea.vmem %s1505_s12, 64  ;;  %s1211_s11 = smov [#allocation11]  }
 0x179   : > { %p1079_p0 = scmp.ne.s32.totalorder %s1505_s12, %s1078_s24  ;;  %s1082_s18 = sshll.u32 %s1211_s11, 4  ;;  %s1083_s18 = int_to_ptr.vmem [resolvable:$false] %s1082_s18 }
 0x17a   : > { %s1084_s8 = scalar_lea.vmem %s1083_s18, 128  ;;  %p1085_p8 = scmp.lt.s32.totalorder %s1505_s12, %s1083_s18 }
 0x17b   : > { %p1080_p2 = pnand %p1079_p0, %p1406_p10  ;;  %p1086_p1 = scmp.lt.s32.totalorder %s1084_s8, %s1078_s24 }
 0x17d   : > { %p1081_p4 = pneg %p1080_p2  ;;  %p1087_p12 = por %p1086_p1, %p1085_p8 }
 0x17f   : > { %p1088_p11 = pnand %p1087_p12, %p1081_p4 }
 0x181   : > { %1091 = shalt.err (!%p1088_p11)
}
 0x182   : > { %s1092_s27 = scalar_lea.hbm %s1503_s20, 64  ;;  %s1096_s14 = scalar_lea.hbm %s1628_s5, 128 }
 0x183   : > { %p1093_p13 = scmp.ne.s32.totalorder %s1503_s20, %s1092_s27  ;;  %p1097_p5 = scmp.lt.u32.totalorder %s1503_s20, %s1628_s5 }
 0x184   : > { %p1098_p7 = scmp.lt.u32.totalorder %s1096_s14, %s1092_s27  ;;  %p1100_p0 = scmp.lt.u32.totalorder %s1092_s27, %s1503_s20 }
 0x185   : > { %p1094_p6 = pnand %p1093_p13, %p1406_p10 }
 0x186   : > { %p1099_p9 = por %p1098_p7, %p1097_p5 }
 0x187   : > { %p1095_p3 = pneg %p1094_p6 }
 0x188   : > { %p1101_p2 = por %p1100_p0, %p1099_p9 }
 0x18a   : > { %p1102_p4 = pnand %p1101_p2, %p1095_p3 }
 0x18c   : > { %1105 = shalt.err (!%p1102_p4)
}
 0x18d   : > { %838 = dma.vmem_to_hbm [thread:$0]  (%p1406_p10), %s1505_s12, 64, %s1503_s20, %s1540_s7   ;;  %v523_v18 = vpop.f32.mrb[4].mxu0 }
 0x18e   : > { %v529_v19 = vpack.c.bf16 %v523_v18, %v523_v18  ;;  %v821_v20 = vpop.f32.mrb[5].mxu0  ;;  %s1568_s18 = scalar_lea.hbm %s1629_s6, %s1484_s29  ;;  %s1106_s8 = scalar_lea.vmem %s1571_s15, 64 }
 0x18f   : > { %v526_v21 = vpop.f32.mrb[6].mxu0  ;;  %p1107_p8 = scmp.ne.s32.totalorder %s1571_s15, %s1106_s8  ;;  %s1212_s12 = smov [#allocation13]  }
 0x190   : > { %v822_v22 = vpop.f32.mrb[7].mxu0  ;;  %530 = vst.msk [vmem:[%s349_s13] sm:$0xf] %vm413_vm2, %v529_v19  ;;  %s1110_s20 = sshll.u32 %s1212_s12, 4  ;;  %s1111_s20 = int_to_ptr.vmem [resolvable:$false] %s1110_s20 }
 0x191   : > { %p1108_p1 = pnand %p1107_p8, %p1406_p10  ;;  %s1112_s29 = scalar_lea.vmem %s1111_s20, 128 }
 0x192   : > { %p1113_p11 = scmp.lt.s32.totalorder %s1571_s15, %s1111_s20  ;;  %p1114_p13 = scmp.lt.s32.totalorder %s1112_s29, %s1106_s8 }
 0x193   : > { %p1109_p12 = pneg %p1108_p1 }
 0x194   : > { %p1115_p6 = por %p1114_p13, %p1113_p11 }
 0x196   : > { %p1116_p3 = pnand %p1115_p6, %p1109_p12 }
 0x198   : > { %1119 = shalt.err (!%p1116_p3)
}
 0x199   : > { %s1120_s17 = scalar_lea.hbm %s1568_s18, 64  ;;  %s1124_s9 = scalar_lea.hbm %s1629_s6, 128 }
 0x19a   : > { %p1121_p5 = scmp.ne.s32.totalorder %s1568_s18, %s1120_s17  ;;  %p1125_p0 = scmp.lt.u32.totalorder %s1568_s18, %s1629_s6 }
 0x19b   : > { %p1126_p2 = scmp.lt.u32.totalorder %s1124_s9, %s1120_s17  ;;  %p1128_p8 = scmp.lt.u32.totalorder %s1120_s17, %s1568_s18 }
 0x19c   : > { %p1122_p7 = pnand %p1121_p5, %p1406_p10 }
 0x19d   : > { %p1127_p4 = por %p1126_p2, %p1125_p0 }
 0x19e   : > { %p1123_p9 = pneg %p1122_p7 }
 0x19f   : > { %p1129_p1 = por %p1128_p8, %p1127_p4 }
 0x1a1   : > { %p1130_p12 = pnand %p1129_p1, %p1123_p9 }
 0x1a3   : > { %1133 = shalt.err (!%p1130_p12)
}
 0x1a4   : > { %839 = dma.vmem_to_hbm [thread:$0]  (%p1406_p10), %s1571_s15, 64, %s1568_s18, %s1540_s7  }
 0x1a5 PF: > { %s1653_s30 = sld [smem:[#allocation19_spill]]  ;;  %s1654_s21 = sld [smem:[#allocation20_spill]] }
 0x1a6   : > { %p1656_p13 = scmp.ge.s32.totalorder %s1200_s26, 2 }
 0x1ab   : > { %s596_s24 = sand.u32 1, %s1653_s30   ;;  %p1655_p11 = scmp.ne.s32.totalorder %s1654_s21, 0 }
 0x1ac   : > { %s597_s11 = scalar_lea.sflag [#allocation4], %s596_s24 }
 0x1ad   : > { %p858_p6 = pnand %p1656_p13, %p1655_p11 }
 0x1af   : > { %1171 = dma.done.wait (!%p858_p6), %s597_s11, 64  }
 0x1b0   : > { %1173 = vsyncadd (!%p858_p6), %s597_s11, 4294967232  ;;  %s1657_s8 = sadd.s32 4294967294, %s1200_s26  }
 0x1b1   : > { %s605_s12 = sand.u32 1, %s1657_s8  }
 0x1b2   : > { %s606_s20 = scalar_lea.sflag [#allocation12], %s605_s12 }
 0x1b3   : > { %1175 = dma.done.wait (!%p858_p6), %s606_s20, 128  }
 0x1b4   : > { %1177 = vsyncadd (!%p858_p6), %s606_s20, 4294967168  ;;  %s28_s26 = sadd.s32 1, %s1200_s26   ;;  %s1658_s21 = smov %s1184_s22 }
 0x1b5   : > { %p25_p10 = scmp.ge.s32.totalorder %s28_s26, 4   ;;  %s1659_s22 = smov %s1188_s23 }
 0x1b6   : > { %s1660_s23 = smov %s1418_s16  ;;  %s1661_s24 = smov %s1196_s25 }
 0x1b7   : > { %s1662_s25 = smov %s1664_s10  ;;  %27 = sbr.rel (!%p25_p10) target bundleno = 10 (0xa), region = 125 }
 0x1be   :  { %620 = vsyncpa [#allocation3], 1 }
 0x1bf   :  { %622 = vsyncpa [#allocation3 + $0x1], 1 }
 0x1c0   :  { %623 = vsyncpa [#allocation6], 1 }
 0x1c1   :  { %624 = vsyncpa [#allocation9], 1 }
 0x1c2   :  { %625 = vsyncpa [#allocation4], 1 }
 0x1c3   :  { %627 = vsyncpa [#allocation4 + $0x1], 1 }
 0x1c4   :  { %628 = vsyncpa [#allocation12], 1 }
 0x1c5   :  { %630 = vsyncpa [#allocation12 + $0x1], 1 }

</bundles_post_ra>
